<compile_context>
chip_gen: v5e
topology: v5e:2x2
jax: 0.10.0
libtpu: 0.0.40
codegen_flags: <defaults>
</compile_context>

<pallas_src>
import functools

import jax
import jax.numpy as jnp
from jax.experimental import pallas as pl
from jax.experimental.pallas import tpu as pltpu


_LANE = 128
_MAX_TN = 1024                                # lane tile cap (multiple of 128)
_VMEM_TILE_BUDGET_BYTES = 16 * 1024 * 1024    # per-step resident incl. double-buffering
_VMEM_LIMIT_BYTES = 32 * 1024 * 1024          # explicit scoped-VMEM limit (safe v5e/v6e/v7x)
_MIN_SPLIT_BYTES = 1 << 20                    # force multi-step grid above this (megacore)


def _sublane_multiple(dtype) -> int:
    # (8,128) f32 / (16,128) bf16 / (32,128) int8-fp8 sublane tiling.
    return {4: 8, 2: 16, 1: 32}.get(jnp.dtype(dtype).itemsize, 8)


def _round_up(x, k):
    return ((x + k - 1) // k) * k


def _round_down(x, k):
    return (x // k) * k


def _cat_addmm_kernel(x1_ref, out_ref, *, add_const):
    # ones(b,c) @ ones(c,m) == c everywhere, so addmm reduces to a VPU add of
    # the compile-time constant c, done natively in the input dtype (2 is exact
    # in f32/bf16/int, so this matches the f32-accumulating MXU path bit-wise).
    v1 = x1_ref[...] + jnp.asarray(add_const, dtype=x1_ref.dtype)
    # torch.cat([v1, v1], dim=0) expressed as the two leading slabs of a
    # (2, tm, tn) output block: both stores are full, sublane/lane-aligned.
    out_ref[0] = v1
    out_ref[1] = v1


def _launch(x2d, add_const):
    """Run the add-and-duplicate kernel on a 2-D slab, returning (2, R, C)."""
    rows, cols = x2d.shape
    dtype = x2d.dtype
    itemsize = jnp.dtype(dtype).itemsize
    sub = _sublane_multiple(dtype)

    # Column (lane) tile: full width when narrow, else a lane-dense 128-multiple.
    tn = cols if cols <= _MAX_TN else _MAX_TN

    # Row tile from the VMEM budget: 1 input tile + 2-high output block,
    # doubled by the pipeline -> ~6 * tm * tn * itemsize resident per step.
    budget_elems = _VMEM_TILE_BUDGET_BYTES // (6 * itemsize)
    tm_budget = max(sub, _round_down(max(budget_elems // max(tn, 1), sub), sub))
    tm = rows if rows <= tm_budget else tm_budget

    # Give the grid several steps once the work is non-trivial, even when a
    # single block would fit (v7x megacore: 2 TensorCores share "parallel" axes).
    total_bytes = rows * cols * itemsize
    if (tm == rows and tn == cols and total_bytes >= _MIN_SPLIT_BYTES
            and rows >= 8 * sub):
        tm = max(sub, _round_up(pl.cdiv(rows, 8), sub))

    grid = (pl.cdiv(rows, tm), pl.cdiv(cols, tn))

    return pl.pallas_call(
        functools.partial(_cat_addmm_kernel, add_const=add_const),
        out_shape=jax.ShapeDtypeStruct((2, rows, cols), dtype),
        grid=grid,
        in_specs=[pl.BlockSpec((tm, tn), lambda i, j: (i, j))],
        out_specs=pl.BlockSpec((2, tm, tn), lambda i, j: (0, i, j)),
        compiler_params=pltpu.CompilerParams(
            dimension_semantics=("parallel", "parallel"),
            vmem_limit_bytes=_VMEM_LIMIT_BYTES,
        ),
    )(x2d)


def cat_addmm(x1, *, inner_dim=2):
    """Equivalent of: cat([addmm(x1, ones(b, c), ones(c, m))] * 2, dim=0).

    `inner_dim` is the module's hard-coded c (=2); ones(b,c) @ ones(c,m) == c
    in every position, so the result is simply x1 + c duplicated along dim 0.
    """
    b, m = x1.shape
    add_const = inner_dim
    n = b * m

    if 0 < m < _LANE and n % _LANE == 0:
        # Lane-dense relayout for narrow m: process x1 as a flat (n/L, L) slab
        # (L a large multiple of 128 dividing n) so both output stores are
        # unmasked full-lane vst's; reshape back outside the kernel.
        lane = _LANE
        for k in range(min(_MAX_TN, n) // _LANE, 0, -1):
            if n % (_LANE * k) == 0:
                lane = _LANE * k
                break
        out3 = _launch(x1.reshape(n // lane, lane), add_const)
    else:
        out3 = _launch(x1, add_const)

    # (2, ...) leading axis is row-major contiguous == cat([v1, v1], dim=0).
    return out3.reshape(2 * b, m)


if __name__ == "__main__":
    key = jax.random.PRNGKey(0)

    # Shape the module exercises: x1 = randn(3, 2)  (tiny full-block path).
    x1 = jax.random.normal(key, (3, 2), dtype=jnp.float32)
    out = cat_addmm(x1)
    jax.block_until_ready(out)
    v1_ref = x1 + 2.0
    expected = jnp.concatenate([v1_ref, v1_ref], axis=0)
    assert out.shape == (6, 2), out.shape
    assert jnp.allclose(out, expected, atol=1e-6)

    # Narrow-m lane-dense relayout path: (64, 32) -> flat (2, 1024) slab.
    x1_narrow = jax.random.normal(jax.random.PRNGKey(1), (64, 32), dtype=jnp.float32)
    out_narrow = cat_addmm(x1_narrow)
    jax.block_until_ready(out_narrow)
    expected_narrow = jnp.concatenate([x1_narrow + 2.0, x1_narrow + 2.0], axis=0)
    assert out_narrow.shape == (128, 32), out_narrow.shape
    assert jnp.allclose(out_narrow, expected_narrow, atol=1e-6)

    # Multi-step 2-D-tiled grid path (forced row split for megacore).
    x1_big = jax.random.normal(jax.random.PRNGKey(2), (1024, 512), dtype=jnp.float32)
    out_big = cat_addmm(x1_big)
    jax.block_until_ready(out_big)
    expected_big = jnp.concatenate([x1_big + 2.0, x1_big + 2.0], axis=0)
    assert out_big.shape == (2048, 512), out_big.shape
    assert jnp.allclose(out_big, expected_big, atol=1e-6)

    print("KERNEL_OK")
</pallas_src>

<mosaic_0001>
module attributes {stable_mosaic.version = 11 : i64} {
  func.func @_cat_addmm_kernel(%arg0: i32, %arg1: i32, %arg2: memref<3x2xf32, #tpu.memory_space<vmem>>, %arg3: memref<2x3x2xf32, #tpu.memory_space<vmem>>) attributes {dimension_semantics = [#tpu.dimension_semantics<parallel>, #tpu.dimension_semantics<parallel>], iteration_bounds = array<i64: 1, 1>, scalar_prefetch = 0 : i64, scratch_operands = 0 : i64, tpu.core_type = #tpu.core_type<tc>, window_params = [{transform_indices = @transform_0, window_bounds = array<i64: 3, 2>}, {transform_indices = @transform_1, window_bounds = array<i64: 2, 3, 2>}]} {
    %c0 = arith.constant 0 : index
    %c0_0 = arith.constant 0 : index
    %0 = vector.load %arg2[%c0, %c0_0] : memref<3x2xf32, #tpu.memory_space<vmem>>, vector<3x2xf32>
    %cst = arith.constant 2.000000e+00 : f32
    %1 = vector.broadcast %cst : f32 to vector<3x2xf32>
    %2 = arith.addf %0, %1 : vector<3x2xf32>
    %c0_1 = arith.constant 0 : index
    %c0_2 = arith.constant 0 : index
    %c0_3 = arith.constant 0 : index
    %3 = vector.load %arg3[%c0_1, %c0_2, %c0_3] : memref<2x3x2xf32, #tpu.memory_space<vmem>>, vector<1x3x2xf32>
    %4 = vector.shape_cast %3 : vector<1x3x2xf32> to vector<3x2xf32>
    %5 = vector.shape_cast %2 : vector<3x2xf32> to vector<1x3x2xf32>
    tpu.vector_store %arg3[%c0_1, %c0_2, %c0_3], %5 {strides = array<i32>} : memref<2x3x2xf32, #tpu.memory_space<vmem>>, vector<1x3x2xf32>,
    %c1 = arith.constant 1 : index
    %c0_4 = arith.constant 0 : index
    %c0_5 = arith.constant 0 : index
    %6 = vector.load %arg3[%c1, %c0_4, %c0_5] : memref<2x3x2xf32, #tpu.memory_space<vmem>>, vector<1x3x2xf32>
    %7 = vector.shape_cast %6 : vector<1x3x2xf32> to vector<3x2xf32>
    %8 = vector.shape_cast %2 : vector<3x2xf32> to vector<1x3x2xf32>
    tpu.vector_store %arg3[%c1, %c0_4, %c0_5], %8 {strides = array<i32>} : memref<2x3x2xf32, #tpu.memory_space<vmem>>, vector<1x3x2xf32>,
    return
  }
  func.func @transform_0(%arg0: i32, %arg1: i32) -> (i32, i32) {
    %c0_i32 = arith.constant 0 : i32
    return %arg0, %arg1 : i32, i32
  }
  func.func @transform_1(%arg0: i32, %arg1: i32) -> (i32, i32, i32) {
    %c0_i32 = arith.constant 0 : i32
    %c0_i32_0 = arith.constant 0 : i32
    return %c0_i32, %arg0, %arg1 : i32, i32, i32
  }
}

</mosaic_0001>

<bundles_post_ra>
// kernel: tpu_custom_call.1
= control target key start
LH: loop header
LB: loop body
LE: loop exit
PB: predicated region body
PF: predicated region fallthrough
CT: control target
= control target key end

     0   :  { %vm10_vm0 = vcmask 10240   ;;  %s38_s0 = inlined_call_operand.vmem [shape: f32[3,2], index: 0, kind: input, shape index: {}]   ;;  %s39_s1 = inlined_call_operand.vmem [shape: f32[2,3,2], index: 1, kind: output, shape index: {}]  }
   0x1   :  { %v8_v0 = vld [vmem:[%s38_s0] sm:$0x7] }
   0x2   :  { %v9_v1 = vadd.f32 2.0, %v8_v0 }
   0x4   :  { %11 = vst.msk [vmem:[%s39_s1] sm:$0x7] %vm10_vm0, %v9_v1 }
   0x5   :  { %18 = vst.msk [vmem:[%s39_s1 + $0x4] sm:$0x7] %vm10_vm0, %v9_v1 }

</bundles_post_ra>
